<compile_context>
chip_gen: v5e
topology: v5e:2x2
jax: 0.10.0
libtpu: 0.0.40
codegen_flags: <defaults>
</compile_context>

<pallas_src>
import math

import jax
import jax.numpy as jnp
from jax.experimental import pallas as pl
from jax.experimental.pallas import tpu as pltpu


# --------------------------------- kernel ------------------------------------

def _rope_kernel(x_ref, cos_ref, sin_e_ref, sin_o_ref, o_ref):
    """x_ref: (Rt, L) block, tables: (1, L) rows broadcast over sublanes.

    out[p] = x[p]*cos[p] + x[p+1]*sin_e[p] + x[p-1]*sin_o[p]
    where sin_e is nonzero only at even lanes (-sin) and sin_o only at odd
    lanes (+sin), so circular wraparound of the rolls always hits a zero tap.
    """
    x = x_ref[...].astype(jnp.float32)
    L = x.shape[-1]
    x_next = pltpu.roll(x, L - 1, 1)   # x[:, p+1]  (circular roll by -1)
    x_prev = pltpu.roll(x, 1, 1)       # x[:, p-1]  (circular roll by +1)
    y = x * cos_ref[...] + x_next * sin_e_ref[...] + x_prev * sin_o_ref[...]
    o_ref[...] = y.astype(o_ref.dtype)


# --------------------------------- wrapper ------------------------------------

def _pick_row_tile(rows, lanes, elem_bytes=4):
    """Rows per grid step: amortize per-step overhead while keeping the
    (rt, lanes) x/out blocks (double-buffered) within a few MiB of VMEM
    (safe for v7x's 64 MiB as well as v5e/v6e's 128 MiB)."""
    budget = 2 * 1024 * 1024            # bytes per x block
    max_rt = max(8, budget // (lanes * elem_bytes))
    if rows <= max_rt:
        return rows
    rt = (max_rt // 8) * 8
    while rt >= 8:
        if rows % rt == 0:
            return rt
        rt -= 8
    return rows


def make_rope_tables(dim, max_seq_len=512, base=10000.0):
    """Same buffers as the PyTorch RoPE.__init__: sin/cos of (max_seq_len, dim//2)."""
    position = jnp.arange(max_seq_len, dtype=jnp.float32)[:, None]
    div_term = jnp.exp(jnp.arange(0, dim, 2, dtype=jnp.float32) *
                       (-jnp.log(jnp.float32(base)) / dim))
    sinusoid = position * div_term[None, :]
    return jnp.sin(sinusoid), jnp.cos(sinusoid)


def rope_forward(x, sin, cos):
    """RoPE forward. x: (..., N, D) with D even; sin/cos: (max_seq_len, D//2)."""
    orig_shape = x.shape
    N, D = orig_shape[-2], orig_shape[-1]
    assert D % 2 == 0, "RoPE dim must be even"
    lead = orig_shape[:-2]
    rows = int(math.prod(lead)) if lead else 1
    L = N * D

    # Host-side (init-style) table prep: interleave cos, bake the +/- parity
    # pattern into two zero-padded sin taps, flatten over (N, D) so a single
    # (1, L) row serves every batch/head (no per-head tiling of the tables).
    sin_n = sin[:N]
    cos_n = cos[:N]
    zeros = jnp.zeros_like(sin_n)
    cos_flat = jnp.repeat(cos_n, 2, axis=1).reshape(1, L)
    sin_even = jnp.stack([-sin_n, zeros], axis=-1).reshape(1, L)  # acts on x[p+1]
    sin_odd = jnp.stack([zeros, sin_n], axis=-1).reshape(1, L)    # acts on x[p-1]

    x2d = x.reshape(rows, L)                 # contiguous reshape, no transpose
    rt = _pick_row_tile(rows, L, jnp.dtype(x.dtype).itemsize)
    grid = (rows // rt,)

    out2d = pl.pallas_call(
        _rope_kernel,
        out_shape=jax.ShapeDtypeStruct((rows, L), x.dtype),
        grid=grid,
        in_specs=[
            pl.BlockSpec((rt, L), lambda r: (r, 0)),
            # constant index_map -> tables are fetched into VMEM only once
            pl.BlockSpec((1, L), lambda r: (0, 0)),
            pl.BlockSpec((1, L), lambda r: (0, 0)),
            pl.BlockSpec((1, L), lambda r: (0, 0)),
        ],
        out_specs=pl.BlockSpec((rt, L), lambda r: (r, 0)),
        compiler_params=pltpu.CompilerParams(dimension_semantics=("parallel",)),
    )(x2d, cos_flat, sin_even, sin_odd)
    return out2d.reshape(orig_shape)


# ------------------------------- reference ------------------------------------

def rope_reference(x, sin, cos):
    """Pure-JAX mirror of the PyTorch forward (for correctness checking)."""
    N = x.shape[-2]
    s = sin[:N]
    c = cos[:N]
    x1 = x[..., 0::2]
    x2 = x[..., 1::2]
    out = jnp.stack([x1 * c - x2 * s, x1 * s + x2 * c], axis=-1)
    return out.reshape(x.shape)


# ----------------------------------- main --------------------------------------

if __name__ == "__main__":
    B, H, N, D = 2, 4, 8, 32          # batch, heads, seq, rotary dim
    key = jax.random.PRNGKey(0)
    x = jax.random.normal(key, (B, H, N, D), jnp.float32)

    sin, cos = make_rope_tables(D, max_seq_len=512)

    out = rope_forward(x, sin, cos)
    out = jax.block_until_ready(out)

    ref = rope_reference(x, sin, cos)
    assert out.shape == x.shape
    assert bool(jnp.all(jnp.isfinite(out)))
    assert bool(jnp.allclose(out, ref, atol=1e-5, rtol=1e-5))
    print("KERNEL_OK")
</pallas_src>

<mosaic_0001>
module attributes {stable_mosaic.version = 11 : i64} {
  func.func @_rope_kernel(%arg0: i32, %arg1: memref<8x256xf32, #tpu.memory_space<vmem>>, %arg2: memref<1x256xf32, #tpu.memory_space<vmem>>, %arg3: memref<1x256xf32, #tpu.memory_space<vmem>>, %arg4: memref<1x256xf32, #tpu.memory_space<vmem>>, %arg5: memref<8x256xf32, #tpu.memory_space<vmem>>) attributes {dimension_semantics = [#tpu.dimension_semantics<parallel>], iteration_bounds = array<i64: 1>, scalar_prefetch = 0 : i64, scratch_operands = 0 : i64, tpu.core_type = #tpu.core_type<tc>, window_params = [{transform_indices = @transform_0, window_bounds = array<i64: 8, 256>}, {pipeline_mode = #tpu.pipeline_mode<synchronous>, transform_indices = @transform_1, window_bounds = array<i64: 1, 256>}, {pipeline_mode = #tpu.pipeline_mode<synchronous>, transform_indices = @transform_2, window_bounds = array<i64: 1, 256>}, {pipeline_mode = #tpu.pipeline_mode<synchronous>, transform_indices = @transform_3, window_bounds = array<i64: 1, 256>}, {transform_indices = @transform_4, window_bounds = array<i64: 8, 256>}]} {
    %c0 = arith.constant 0 : index
    %c0_0 = arith.constant 0 : index
    %0 = vector.load %arg1[%c0, %c0_0] : memref<8x256xf32, #tpu.memory_space<vmem>>, vector<8x256xf32>
    %c255_i32 = arith.constant 255 : i32
    %1 = tpu.dynamic_rotate %0 by %c255_i32 dim 1 : vector<8x256xf32>, i32 -> vector<8x256xf32>
    %c1_i32 = arith.constant 1 : i32
    %2 = tpu.dynamic_rotate %0 by %c1_i32 dim 1 : vector<8x256xf32>, i32 -> vector<8x256xf32>
    %c0_1 = arith.constant 0 : index
    %c0_2 = arith.constant 0 : index
    %3 = vector.load %arg2[%c0_1, %c0_2] : memref<1x256xf32, #tpu.memory_space<vmem>>, vector<1x256xf32>
    %4 = vector.broadcast %3 : vector<1x256xf32> to vector<8x256xf32>
    %5 = arith.mulf %0, %4 : vector<8x256xf32>
    %c0_3 = arith.constant 0 : index
    %c0_4 = arith.constant 0 : index
    %6 = vector.load %arg3[%c0_3, %c0_4] : memref<1x256xf32, #tpu.memory_space<vmem>>, vector<1x256xf32>
    %7 = vector.broadcast %6 : vector<1x256xf32> to vector<8x256xf32>
    %8 = arith.mulf %1, %7 : vector<8x256xf32>
    %9 = arith.addf %5, %8 : vector<8x256xf32>
    %c0_5 = arith.constant 0 : index
    %c0_6 = arith.constant 0 : index
    %10 = vector.load %arg4[%c0_5, %c0_6] : memref<1x256xf32, #tpu.memory_space<vmem>>, vector<1x256xf32>
    %11 = vector.broadcast %10 : vector<1x256xf32> to vector<8x256xf32>
    %12 = arith.mulf %2, %11 : vector<8x256xf32>
    %13 = arith.addf %9, %12 : vector<8x256xf32>
    %c0_7 = arith.constant 0 : index
    %c0_8 = arith.constant 0 : index
    %14 = vector.load %arg5[%c0_7, %c0_8] : memref<8x256xf32, #tpu.memory_space<vmem>>, vector<8x256xf32>
    tpu.vector_store %arg5[%c0_7, %c0_8], %13 {strides = array<i32>} : memref<8x256xf32, #tpu.memory_space<vmem>>, vector<8x256xf32>,
    return
  }
  func.func @transform_0(%arg0: i32) -> (i32, i32) {
    %c0_i32 = arith.constant 0 : i32
    %c0_i32_0 = arith.constant 0 : i32
    return %arg0, %c0_i32 : i32, i32
  }
  func.func @transform_1(%arg0: i32) -> (i32, i32) {
    %c0_i32 = arith.constant 0 : i32
    %c0_i32_0 = arith.constant 0 : i32
    %c0_i32_1 = arith.constant 0 : i32
    return %c0_i32, %c0_i32_0 : i32, i32
  }
  func.func @transform_2(%arg0: i32) -> (i32, i32) {
    %c0_i32 = arith.constant 0 : i32
    %c0_i32_0 = arith.constant 0 : i32
    %c0_i32_1 = arith.constant 0 : i32
    return %c0_i32, %c0_i32_0 : i32, i32
  }
  func.func @transform_3(%arg0: i32) -> (i32, i32) {
    %c0_i32 = arith.constant 0 : i32
    %c0_i32_0 = arith.constant 0 : i32
    %c0_i32_1 = arith.constant 0 : i32
    return %c0_i32, %c0_i32_0 : i32, i32
  }
  func.func @transform_4(%arg0: i32) -> (i32, i32) {
    %c0_i32 = arith.constant 0 : i32
    %c0_i32_0 = arith.constant 0 : i32
    return %arg0, %c0_i32 : i32, i32
  }
}

</mosaic_0001>

<bundles_post_ra>
// kernel: tpu_custom_call.1
= control target key start
LH: loop header
LB: loop body
LE: loop exit
PB: predicated region body
PF: predicated region fallthrough
CT: control target
= control target key end

     0   :  { %9 = vsyncpa [#allocation3], 0  ;;  %s279_s0 = inlined_call_operand.hbm [shape: f32[8,256], index: 0, kind: input, shape index: {}]   ;;  %s280_s1 = inlined_call_operand.hbm [shape: f32[1,256], index: 1, kind: input, shape index: {}]   ;;  %s281_s2 = inlined_call_operand.hbm [shape: f32[1,256], index: 2, kind: input, shape index: {}]   ;;  %s282_s3 = inlined_call_operand.vmem [shape: f32[1,256], index: 3, kind: input, shape index: {}]   ;;  %s283_s4 = inlined_call_operand.hbm [shape: f32[8,256], index: 4, kind: output, shape index: {}]  }
   0x1   :  { %10 = vsyncpa [#allocation6], 0  ;;  %s28_s17 = sshll.u32 %s280_s1, 4  ;;  %s29_s17 = int_to_ptr.hbm [resolvable:$true] %s28_s17 }
   0x2   :  { %11 = vsyncpa [#allocation4], 0  ;;  %s233_s18 = smov [#allocation5]   ;;  %s17_s22 = sshll.u32 %s279_s0, 4  ;;  %s18_s22 = int_to_ptr.hbm [resolvable:$true] %s17_s22 }
   0x3   :  { %s30_s19 = sshll.u32 %s233_s18, 4  ;;  %s234_s23 = smov [#allocation2]   ;;  %s31_s19 = int_to_ptr.vmem [resolvable:$true] %s30_s19 }
   0x4   :  { %33 = dma.hbm_to_vmem [thread:$0]  %s29_s17, 32, %s31_s19, [#allocation6]  }
   0x5   :  { %s19_s24 = sshll.u32 %s234_s23, 4  ;;  %s39_s27 = sshll.u32 %s281_s2, 4  ;;  %s20_s24 = int_to_ptr.vmem [resolvable:$true] %s19_s24  ;;  %s40_s27 = int_to_ptr.hbm [resolvable:$true] %s39_s27 }
   0x6   :  { %22 = dma.hbm_to_vmem [thread:$0]  %s18_s22, 256, %s20_s24, [#allocation3]  }
   0x7   :  { %s235_s1 = smov [#allocation7]  }
   0x8   :  { %s41_s28 = sshll.u32 %s235_s1, 4  ;;  %s42_s28 = int_to_ptr.vmem [resolvable:$true] %s41_s28 }
   0x9   :  { %44 = dma.hbm_to_vmem [thread:$0]  %s40_s27, 32, %s42_s28, [#allocation6]  }
   0xa   :  { %227 = dma.done.wait [#allocation3], 256  }
   0xb   :  { %228 = vsyncadd [#allocation3], 4294967040 }
   0xc   :  { %229 = dma.done.wait [#allocation6], 64  }
   0xd   :  { %230 = vsyncadd [#allocation6], 4294967232  ;;  %v59_v0 = vld [vmem:[#allocation2] sm:$0xff]  ;;  %s236_s0 = smov 1   ;;  %s237_s29 = smov 127   ;;  %v60_v1 = vld [vmem:[#allocation2 + $0x8] sm:$0xff]  ;;  %v65_v2 = vlaneseq }
   0xe   :  { %70 = vrot.lane.b32.xlu1 %v59_v0, %s236_s0  ;;  %61 = vrot.lane.b32.xlu0 %v59_v0, %s237_s29  ;;  %v77_v5 = vld [vmem:[#allocation5] sm:$0x3]  ;;  %v85_v7 = vld [vmem:[#allocation7] sm:$0x3]  ;;  %v95_v10 = vld [vmem:[%s282_s3] sm:$0x3] }
   0xf   :  { %v66_v6 = vand.u32 127, %v65_v2  ;;  %v79_v8 = vperm.slane %v77_v5, 0  ;;  %v80_v9 = vperm.slane %v77_v5, 1  ;;  %v87_v11 = vperm.slane %v85_v7, 0  ;;  %s238_s3 = smov [#allocation8]   ;;  %s114_s8 = sshll.u32 %s283_s4, 4  ;;  %s115_s8 = int_to_ptr.hbm [resolvable:$true] %s114_s8 }
  0x10   :  { %v88_v12 = vperm.slane %v85_v7, 1  ;;  %v97_v15 = vperm.slane %v95_v10, 0  ;;  %v98_v16 = vperm.slane %v95_v10, 1  ;;  %s112_s5 = sshll.u32 %s238_s3, 4  ;;  %s113_s5 = int_to_ptr.vmem [resolvable:$true] %s112_s5 }
  0x11   :  { %vm74_vm0 = vcmp.lt.s32.totalorder %v66_v6, 1  ;;  %vm67_vm1 = vcmp.lt.s32.totalorder %v66_v6, 127  ;;  %v83_v13 = vmul.f32 %v79_v8, %v59_v0  ;;  %v84_v14 = vmul.f32 %v80_v9, %v60_v1 }
  0x16   :  { %72 = vrot.lane.b32.xlu1 %v60_v1, %s236_s0  ;;  %63 = vrot.lane.b32.xlu0 %v60_v1, %s237_s29 }
  0x80   :  { %v71_v3 = vpop.permute.xlu1 %70  ;;  %v62_v4 = vpop.permute.xlu0 %61 }
  0x88   :  { %v73_v17 = vpop.permute.xlu1 %72  ;;  %v64_v18 = vpop.permute.xlu0 %63 }
  0x89   :  { %v75_v19 = vsel %vm74_vm0, %v71_v3, %v73_v17  ;;  %v76_v20 = vsel %vm74_vm0, %v73_v17, %v71_v3  ;;  %v68_v21 = vsel %vm67_vm1, %v62_v4, %v64_v18  ;;  %v69_v22 = vsel %vm67_vm1, %v64_v18, %v62_v4 }
  0x8a   :  { %v91_v23 = vmul.f32 %v87_v11, %v68_v21  ;;  %v92_v24 = vmul.f32 %v88_v12, %v69_v22  ;;  %v101_v25 = vmul.f32 %v97_v15, %v76_v20  ;;  %v102_v26 = vmul.f32 %v98_v16, %v75_v19 }
  0x8c   :  { %v93_v27 = vadd.f32 %v91_v23, %v83_v13  ;;  %v94_v28 = vadd.f32 %v92_v24, %v84_v14 }
  0x8e   :  { %v103_v29 = vadd.f32 %v101_v25, %v93_v27  ;;  %v104_v30 = vadd.f32 %v102_v26, %v94_v28 }
  0x90   :  { %105 = vst [vmem:[#allocation8] sm:$0xff] %v103_v29 }
  0x91   :  { %106 = vst [vmem:[#allocation8 + $0x8] sm:$0xff] %v104_v30 }
  0x92   :  { %117 = dma.vmem_to_hbm [thread:$0]  %s113_s5, 256, %s115_s8, [#allocation4]  }
  0x93   :  { %231 = dma.done.wait [#allocation4], 256  }
  0x94   :  { %232 = vsyncadd [#allocation4], 4294967040 }
  0x95   :  { %122 = vsyncpa [#allocation3], 1 }
  0x96   :  { %123 = vsyncpa [#allocation6], 1 }
  0x97   :  { %124 = vsyncpa [#allocation4], 1 }

</bundles_post_ra>
